<compile_context>
chip_gen: v7x
topology: tpu7x:2x2x1
jax: 0.10.0
libtpu: 0.0.40
codegen_flags: <defaults>
</compile_context>

<pallas_src>
import itertools
from functools import lru_cache, partial

import jax
import jax.numpy as jnp
from jax.experimental import pallas as pl
from jax.experimental.pallas import tpu as pltpu


# ----------------------------------------------------------------------------
# VMEM budgeting helpers (padded-footprint math)
# ----------------------------------------------------------------------------
_VMEM_LIMIT_BYTES = 32 * 1024 * 1024   # raise v5e's 16 MiB default; == v7x scoped default
_MEAN_BLOCK_BUDGET = 8 * 1024 * 1024   # only the input block is large (2 x 8 = 16 MiB dbl-buf)
_COPY_BLOCK_BUDGET = 6 * 1024 * 1024   # in + out blocks both large (2 x (6+6) = 24 MiB dbl-buf)


def _cdiv(a, b):
    return (a + b - 1) // b


def _round_up(x, m):
    return ((x + m - 1) // m) * m


def _sublane_pack(dtype):
    # sub-32-bit dtypes pack along sublanes: f32 -> 8, bf16 -> 16, int8/fp8 -> 32
    return 8 * max(1, 4 // jnp.dtype(dtype).itemsize)


def _pick_time_tile(T, D, dtype, budget):
    """Rows per (1, tT, D) block.  Footprint uses padded dims: lanes -> 128, rows -> pack."""
    itemsize = jnp.dtype(dtype).itemsize
    pack = _sublane_pack(dtype)
    padded_row_bytes = _round_up(max(D, 1), 128) * itemsize
    max_rows = max(pack, (budget // padded_row_bytes) // pack * pack)
    if T <= max_rows:
        return T            # single full-extent block (legal for any T, fits the budget)
    return max_rows         # multiple of pack (hence of 8); ceil-div grid + masked tail


def _pick_lane_tile(L, B, dtype, budget):
    """Lane tile (multiple of 128) for a (B, tile) block on a 2-D lane-dense view."""
    itemsize = jnp.dtype(dtype).itemsize
    pack = _sublane_pack(dtype)
    padded_col_bytes = _round_up(max(B, 1), pack) * itemsize
    max_lanes = max(128, (budget // padded_col_bytes) // 128 * 128)
    return min(_round_up(max(L, 1), 128), max_lanes)


# ----------------------------------------------------------------------------
# Kernel 1: time-average of a feature  (get_condition: torch.mean(feat, dim=1,
#           keepdim=True)).  Grid = (B parallel, T-tiles arbitrary); f32 scratch
#           accumulator; masked ragged last tile when T is not tile-aligned.
# ----------------------------------------------------------------------------
@lru_cache(maxsize=None)
def _build_time_mean(B, T, D, dtype_name, budget=_MEAN_BLOCK_BUDGET):
    dtype = jnp.dtype(dtype_name)
    tT = _pick_time_tile(T, D, dtype, budget)
    n_t = _cdiv(T, tT)
    needs_mask = (T % tT) != 0
    inv_t = 1.0 / float(T)

    def kernel(x_ref, o_ref, acc_ref):
        t = pl.program_id(1)

        @pl.when(t == 0)
        def _():
            acc_ref[...] = jnp.zeros_like(acc_ref)

        x = x_ref[...]
        if needs_mask:
            rows = jax.lax.broadcasted_iota(jnp.int32, x.shape, 1)
            x = jnp.where(rows < (T - t * tT), x, jnp.zeros_like(x))
        # reduce-with-promote (no blanket f32 upcast of the tile)
        acc_ref[...] += jnp.sum(x, axis=1, keepdims=True, dtype=jnp.float32)

        @pl.when(t == pl.num_programs(1) - 1)
        def _():
            o_ref[...] = (acc_ref[...] * inv_t).astype(o_ref.dtype)

    return pl.pallas_call(
        kernel,
        out_shape=jax.ShapeDtypeStruct((B, 1, D), dtype),
        grid=(B, n_t),
        in_specs=[pl.BlockSpec((1, tT, D), lambda b, t: (b, t, 0))],
        out_specs=pl.BlockSpec((1, 1, D), lambda b, t: (b, 0, 0)),
        scratch_shapes=[pltpu.VMEM((1, 1, D), jnp.float32)],
        compiler_params=pltpu.CompilerParams(
            dimension_semantics=("parallel", "arbitrary"),
            vmem_limit_bytes=_VMEM_LIMIT_BYTES,
        ),
    )


def time_mean(x, budget=_MEAN_BLOCK_BUDGET):
    B, T, D = x.shape
    return _build_time_mean(B, T, D, x.dtype.name, budget)(x)


# ----------------------------------------------------------------------------
# Kernel 2: lane-dense chunk copy.  x is viewed as (B, T*C); only the
# [:, :chunk_len*C] window is copied with 128-multiple lane tiles (unmasked
# full-width stores).  The (T - chunk_len) tail never leaves HBM.
# ----------------------------------------------------------------------------
@lru_cache(maxsize=None)
def _build_chunk_copy(B, L_in, L_out, dtype_name, budget=_COPY_BLOCK_BUDGET):
    dtype = jnp.dtype(dtype_name)
    tile = _pick_lane_tile(L_out, B, dtype, budget)
    n = _cdiv(L_out, tile)

    def kernel(x_ref, o_ref):
        o_ref[...] = x_ref[...]

    return pl.pallas_call(
        kernel,
        out_shape=jax.ShapeDtypeStruct((B, L_out), dtype),
        grid=(n,),
        in_specs=[pl.BlockSpec((B, tile), lambda i: (0, i))],
        out_specs=pl.BlockSpec((B, tile), lambda i: (0, i)),
        compiler_params=pltpu.CompilerParams(
            dimension_semantics=("parallel",),
            vmem_limit_bytes=_VMEM_LIMIT_BYTES,
        ),
    )


def chunk_copy(x, chunk_len, budget=_COPY_BLOCK_BUDGET):
    B, T, C = x.shape
    x2 = x.reshape(B, T * C)                     # free (row-major contiguous)
    out2 = _build_chunk_copy(B, T * C, chunk_len * C, x.dtype.name, budget)(x2)
    return out2.reshape(B, chunk_len, C)


# ----------------------------------------------------------------------------
# Kernel 3: padded chunk (T < min_len path).  Prefix copy + tail-only pad fill
# in one kernel (no jnp.pad round trip, no double-write of the prefix).
# ----------------------------------------------------------------------------
@lru_cache(maxsize=None)
def _build_pad_chunk(B, T, C, out_len, pad_val, dtype_name):
    dtype = jnp.dtype(dtype_name)

    def kernel(x_ref, o_ref):
        o_ref[:, :T, :] = x_ref[...]
        o_ref[:, T:, :] = jnp.full((B, out_len - T, C), pad_val, dtype=o_ref.dtype)

    # TODO(synk): edge path kept as a single full-extent block; tile it with a grid +
    # pl.when(fill vs copy) if out_len*C ever grows to VMEM scale.
    return pl.pallas_call(
        kernel,
        out_shape=jax.ShapeDtypeStruct((B, out_len, C), dtype),
        in_specs=[pl.BlockSpec((B, T, C), lambda: (0, 0, 0))],
        out_specs=pl.BlockSpec((B, out_len, C), lambda: (0, 0, 0)),
        compiler_params=pltpu.CompilerParams(vmem_limit_bytes=_VMEM_LIMIT_BYTES),
    )


# ----------------------------------------------------------------------------
# Python-side Component skeleton (bookkeeping only — mirrors the nn.Module base)
# ----------------------------------------------------------------------------
class InstanceCounterMeta(type):
    def __init__(cls, name, bases, attrs):
        super().__init__(name, bases, attrs)
        cls._ids = itertools.count(0)


class Component(metaclass=InstanceCounterMeta):
    components_input_dim = {}
    components_output_dim = {}

    def __init__(self, tag="default", input_dim=None):
        self._tag = tag
        self.input_dim = input_dim
        self.id = next(self.__class__._ids)
        self.components_input_dim[self.name] = self.input_dim
        self.components_output_dim[self.name] = partial(lambda s: s.output_dim, self)

    @property
    def name(self):
        return f"{self.__class__.__name__}_{self.id}"

    @property
    def tag(self):
        return self._tag

    @property
    def output_dim(self):
        return self.input_dim

    # TODO(synk): forward_step is abstract in the reference; identity pass-through here.
    def forward_step(self, content, additional_content):
        return content, additional_content

    def forward(self, content, additional_content):
        out, add = self.forward_step(content, additional_content)
        add[self.name] = out
        if self.tag != "default":
            add[self.tag] = out
        return out, add

    # ----- get_condition: per-feature time-average (Pallas) + concat ---------
    def get_condition(self, feats, average_by_time=False):
        # TODO(synk): reference resolves features by name from model inputs /
        # prosody references; here the caller passes the tensors directly.
        g = []
        avg = average_by_time
        for feat in feats:
            if feat.ndim == 2:
                feat = feat[:, None, :]            # unsqueeze(1)
            if feat.shape[1] > 1 and avg:
                feat = time_mean(feat)             # Pallas tiled reduction kernel
            if feat.shape[1] == 1:
                avg = True
            g.append(feat)
        g = jnp.concatenate(g, axis=-1)
        if g.shape[2] == 1:                        # torch squeeze(2) semantics
            g = jnp.squeeze(g, axis=2)
        return g

    # ----- get_chunk: static path of the reference (eval-style) --------------
    @staticmethod
    def get_chunk(x, x_lengths, min_len=None, max_len=None, pad_val=-4.0,
                  lengths_min=None, lengths_max=None):
        B, T, C = x.shape
        x_lengths = x_lengths.astype(jnp.int32)

        if lengths_min is None or (lengths_max is None and max_len is None):
            # TODO(synk): D2H sync + data-dependent recompile; pass lengths_min /
            # lengths_max (or bucketed statics) to avoid stalling dispatch.
            lens = jax.device_get(x_lengths)
            if lengths_min is None:
                lengths_min = int(lens.min())
            if lengths_max is None:
                lengths_max = int(lens.max())

        if min_len is None:
            min_len = int(lengths_min)
        if max_len is None:
            max_len = int(lengths_max)

        if T < int(min_len):
            # pad path: prefix copy + tail pad_val fill inside the kernel
            gt = _build_pad_chunk(B, T, C, int(min_len), float(pad_val), x.dtype.name)(x)
            gt_len = jnp.minimum(x_lengths, T)     # == padded-mask row sums
            return gt, gt_len

        chunk_len = min(int(lengths_min), int(max_len))
        chunk_len = max(int(min_len), chunk_len - chunk_len % 16)

        gt_len = jnp.minimum(x_lengths, chunk_len)  # == mask[:, :chunk_len].sum(-1)
        if chunk_len == T:
            return x, gt_len                        # reference returns x unchanged
        gt = chunk_copy(x, int(chunk_len))          # lane-dense Pallas window copy
        return gt, gt_len


# ----------------------------------------------------------------------------
if __name__ == "__main__":
    key = jax.random.PRNGKey(0)
    k1, k2, k3, k4, k5, k6 = jax.random.split(key, 6)

    B, T, C = 2, 16, 8
    x = jax.random.normal(k1, (B, T, C), dtype=jnp.float32)
    x_lengths = jnp.array([16, 11], dtype=jnp.int32)

    feat_a = jax.random.normal(k2, (B, T, 6), dtype=jnp.float32)   # time-varying feature
    feat_b = jax.random.normal(k3, (B, 4), dtype=jnp.float32)      # 2-D feature (unsqueezed)

    comp = Component(tag="default", input_dim=C)

    # forward (identity pass-through + additional_content bookkeeping)
    content, additional = comp.forward(x, {})
    assert comp.name in additional

    # get_condition hot path (Pallas tiled time-mean + concat)
    cond = jax.block_until_ready(comp.get_condition([feat_a, feat_b], average_by_time=True))
    ref_cond = jnp.concatenate(
        [jnp.mean(feat_a, axis=1, keepdims=True), feat_b[:, None, :]], axis=-1
    )
    assert cond.shape == (B, 1, 10)
    assert jnp.allclose(cond, ref_cond, atol=1e-5)

    # tiled reduction with masked ragged tail (T=20 not tile-aligned; tiny budget -> tT=8)
    feat_c = jax.random.normal(k5, (B, 20, 6), dtype=jnp.float32)
    m = jax.block_until_ready(time_mean(feat_c, budget=4096))
    assert jnp.allclose(m, jnp.mean(feat_c, axis=1, keepdims=True), atol=1e-5)

    # lane-dense chunk copy with ragged last lane tile (L_out=192, tile=128 -> 2 blocks)
    x_c = jax.random.normal(k6, (2, 40, 8), dtype=jnp.float32)
    cc = jax.block_until_ready(chunk_copy(x_c, 24, budget=4096))
    assert cc.shape == (2, 24, 8)
    assert jnp.allclose(cc, x_c[:, :24, :])

    # get_chunk hot path (lane-dense Pallas window copy; scalar length clamp)
    gt, gt_lens = comp.get_chunk(x, x_lengths, min_len=8, max_len=16,
                                 lengths_min=11, lengths_max=16)
    gt = jax.block_until_ready(gt)
    gt_lens = jax.block_until_ready(gt_lens)
    assert gt.shape == (B, 8, C)
    assert jnp.allclose(gt, x[:, :8, :])
    assert jnp.array_equal(gt_lens, jnp.minimum(x_lengths, 8))

    # pad path (T < min_len): in-kernel prefix copy + tail pad_val fill
    x_short = jax.random.normal(k4, (B, 4, C), dtype=jnp.float32)
    short_lengths = jnp.array([4, 3], dtype=jnp.int32)
    gt_p, gl_p = Component.get_chunk(x_short, short_lengths, min_len=8, max_len=16,
                                     lengths_min=3, lengths_max=4)
    gt_p = jax.block_until_ready(gt_p)
    gl_p = jax.block_until_ready(gl_p)
    assert gt_p.shape == (B, 8, C)
    assert jnp.allclose(gt_p[:, :4, :], x_short)
    assert jnp.all(gt_p[:, 4:, :] == -4.0)
    assert jnp.array_equal(gl_p, jnp.minimum(short_lengths, 4))

    print("KERNEL_OK")
</pallas_src>

<mosaic_0001>
module attributes {stable_mosaic.version = 11 : i64} {
  func.func @kernel(%arg0: i32, %arg1: i32, %arg2: memref<1x16x6xf32, #tpu.memory_space<vmem>>, %arg3: memref<1x1x6xf32, #tpu.memory_space<vmem>>, %arg4: memref<1x1x6xf32, #tpu.memory_space<vmem>>) attributes {dimension_semantics = [#tpu.dimension_semantics<parallel>, #tpu.dimension_semantics<arbitrary>], iteration_bounds = array<i64: 2, 1>, scalar_prefetch = 0 : i64, scratch_operands = 1 : i64, tpu.core_type = #tpu.core_type<tc>, window_params = [{transform_indices = @transform_0, window_bounds = array<i64: 1, 16, 6>}, {transform_indices = @transform_1, window_bounds = array<i64: 1, 1, 6>}]} {
    %c0_i32 = arith.constant 0 : i32
    %0 = arith.cmpi eq, %arg1, %c0_i32 : i32
    %1 = arith.extui %0 : i1 to i32
    %c0_i32_0 = arith.constant 0 : i32
    %2 = arith.cmpi ne, %1, %c0_i32_0 : i32
    scf.if %2 {
      %cst_11 = arith.constant 0.000000e+00 : f32
      %12 = vector.broadcast %cst_11 : f32 to vector<1x1x6xf32>
      %c0_12 = arith.constant 0 : index
      %c0_13 = arith.constant 0 : index
      %c0_14 = arith.constant 0 : index
      %13 = vector.load %arg4[%c0_12, %c0_13, %c0_14] : memref<1x1x6xf32, #tpu.memory_space<vmem>>, vector<1x1x6xf32>
      tpu.vector_store %arg4[%c0_12, %c0_13, %c0_14], %12 {strides = array<i32>} : memref<1x1x6xf32, #tpu.memory_space<vmem>>, vector<1x1x6xf32>,
    } else {
    }
    %c0 = arith.constant 0 : index
    %c0_1 = arith.constant 0 : index
    %c0_2 = arith.constant 0 : index
    %3 = vector.load %arg2[%c0, %c0_1, %c0_2] : memref<1x16x6xf32, #tpu.memory_space<vmem>>, vector<1x16x6xf32>
    %c0_3 = arith.constant 0 : index
    %c0_4 = arith.constant 0 : index
    %c0_5 = arith.constant 0 : index
    %4 = vector.load %arg4[%c0_3, %c0_4, %c0_5] : memref<1x1x6xf32, #tpu.memory_space<vmem>>, vector<1x1x6xf32>
    %cst = arith.constant dense<0.000000e+00> : vector<1x6xf32>
    %5 = vector.multi_reduction <add>, %3, %cst [1] : vector<1x16x6xf32> to vector<1x6xf32>
    %6 = vector.shape_cast %5 : vector<1x6xf32> to vector<1x1x6xf32>
    %7 = arith.addf %4, %6 : vector<1x1x6xf32>
    %c0_6 = arith.constant 0 : index
    %c0_7 = arith.constant 0 : index
    %c0_8 = arith.constant 0 : index
    %8 = vector.load %arg4[%c0_6, %c0_7, %c0_8] : memref<1x1x6xf32, #tpu.memory_space<vmem>>, vector<1x1x6xf32>
    tpu.vector_store %arg4[%c0_6, %c0_7, %c0_8], %7 {strides = array<i32>} : memref<1x1x6xf32, #tpu.memory_space<vmem>>, vector<1x1x6xf32>,
    %c0_i32_9 = arith.constant 0 : i32
    %9 = arith.cmpi eq, %arg1, %c0_i32_9 : i32
    %10 = arith.extui %9 : i1 to i32
    %c0_i32_10 = arith.constant 0 : i32
    %11 = arith.cmpi ne, %10, %c0_i32_10 : i32
    scf.if %11 {
      %c0_11 = arith.constant 0 : index
      %c0_12 = arith.constant 0 : index
      %c0_13 = arith.constant 0 : index
      %12 = vector.load %arg4[%c0_11, %c0_12, %c0_13] : memref<1x1x6xf32, #tpu.memory_space<vmem>>, vector<1x1x6xf32>
      %cst_14 = arith.constant 6.250000e-02 : f32
      %13 = vector.broadcast %cst_14 : f32 to vector<1x1x6xf32>
      %14 = arith.mulf %12, %13 : vector<1x1x6xf32>
      %c0_15 = arith.constant 0 : index
      %c0_16 = arith.constant 0 : index
      %c0_17 = arith.constant 0 : index
      %15 = vector.load %arg3[%c0_15, %c0_16, %c0_17] : memref<1x1x6xf32, #tpu.memory_space<vmem>>, vector<1x1x6xf32>
      tpu.vector_store %arg3[%c0_15, %c0_16, %c0_17], %14 {strides = array<i32>} : memref<1x1x6xf32, #tpu.memory_space<vmem>>, vector<1x1x6xf32>,
    } else {
    }
    return
  }
  func.func @transform_0(%arg0: i32, %arg1: i32) -> (i32, i32, i32) {
    %c0_i32 = arith.constant 0 : i32
    %c0_i32_0 = arith.constant 0 : i32
    return %arg0, %arg1, %c0_i32 : i32, i32, i32
  }
  func.func @transform_1(%arg0: i32, %arg1: i32) -> (i32, i32, i32) {
    %c0_i32 = arith.constant 0 : i32
    %c0_i32_0 = arith.constant 0 : i32
    %c0_i32_1 = arith.constant 0 : i32
    return %arg0, %c0_i32, %c0_i32_0 : i32, i32, i32
  }
}

</mosaic_0001>

<bundles_post_ra>
// kernel: tpu_custom_call.1
= control target key start
LH: loop header
LB: loop body
LE: loop exit
PB: predicated region body
PF: predicated region fallthrough
CT: control target
= control target key end

     0   :  { %6 = vsyncpa [#allocation4], 0  ;;  %s526_s0 = inlined_call_operand.vmem [shape: f32[2,16,6], index: 0, kind: input, shape index: {}]   ;;  %s527_s1 = inlined_call_operand.hbm [shape: f32[2,1,6], index: 1, kind: output, shape index: {}]  }
   0x1   :  { %8 = vsyncpa [#allocation4 + $0x1], 0  ;;  %s411_s6 = smov 0   ;;  %s413_s7 = smov 0  }
   0x2   :  { %s415_s8 = smov 0   ;;  %s417_s9 = smov 0  }
   0x3   :  { %s419_s10 = smov 0   ;;  %s421_s11 = smov 0  }
   0x4 LB: > { %s252_s12 = sadd.s32 4294967295, %s397_s11   ;;  %s253_s13 = sadd.s32 4294967294, %s397_s11   ;;  %s397_s11 = sphi %s421_s11, %s14_s11   ;;  %s393_s10 = sphi %s419_s10, %s534_s10   ;;  %s389_s9 = sphi %s417_s9, %s533_s9   ;;  %s385_s8 = sphi %s415_s8, %s532_s8   ;;  %s381_s7 = sphi %s413_s7, %s531_s7   ;;  %s377_s6 = sphi %s411_s6, %s530_s6  }
   0x5   : > { %s26_s14 = sadd.s32 1, %s393_s10  ;;  %s61_s15 = sadd.s32 1, %s385_s8 }
   0x6   : > { %p28_p0 = scmp.ge.s32.totalorder %s26_s14, 2  ;;  %p71_p1 = scmp.ne.s32.totalorder %s385_s8, %s381_s7 }
   0x7   : > { %p72_p2 = scmp.eq.s32.totalorder %s252_s12, 1  ;;  %p77_p3 = scmp.ne.s32.totalorder %s381_s7, %s377_s6 }
   0x8   : > { %s536_s14 = smov (%p28_p0, %s26_s14), 0  ;;  %p78_p5 = scmp.eq.s32.totalorder %s253_s13, 1 }
   0x9   : > { %p451_p4 = por %p72_p2, %p71_p1  ;;  %s58_s17 = ssub.s32 %s393_s10, %s536_s14 }
   0xa   : > { %p256_p6 = scmp.ge.s32.totalorder %s397_s11, 1  ;;  %p59_p7 = scmp.eq.s32.totalorder %s58_s17, 0 }
   0xb   : > { %p458_p8 = por %p78_p5, %p77_p3  ;;  %p109_p9 = scmp.lt.s32.totalorder %s397_s11, 3 }
   0xc   : > { %s464_s19 = scalar_select %p59_p7, %s385_s8, %s61_s15  }
   0xd   : > { %p110_p10 = pnand %p256_p6, %p109_p9 }
   0xe   : > { %vm146_vm0 = vcmask (!%p110_p10), 40960   ;;  %p133_p11 = scmp.lt.s32.totalorder (!%p110_p10), %s389_s9, 1  ;;  %v399_v0 = vmov (!%p110_p10), 0.0   ;;  %vm151_vm1 = vcmask (!%p110_p10), 48128   ;;  %s130_s25 = sand.u32 (!%p110_p10), 1, %s381_s7  }
   0xf   : > { %113 = sbr.rel (%p110_p10) target bundleno = 68 (0x44), region = 24  ;;  %147 = vst.msk [vmem:[#allocation2] sm:$0x1] (!%p110_p10), %vm146_vm0, %v399_v0  ;;  %s131_s26 = scalar_lea.vmem (!%p110_p10), [#allocation3], %s130_s25 }
  0x10   : > { %s183_s27 = sshll.u32 (!%p110_p10), %s131_s26, 4  ;;  %s259_s28 = sshll.u32 (!%p110_p10), %s389_s9, 4  ;;  %s475_s27 = int_to_ptr.vmem [resolvable:$true] %s183_s27 }
  0x11   : > { %s480_s2 = scalar_lea.hbm (!%p110_p10), %s527_s1, %s259_s28  ;;  %s171_s3 = scalar_lea.sflag (!%p110_p10), [#allocation4], %s130_s25 }
  0x12   : > { %s319_s4 = scalar_lea.vmem (!%p110_p10), %s475_s27, 16  ;;  %s400_s5 = smov (!%p110_p10), [#allocation3]  }
  0x13   : > { %p320_p12 = scmp.ne.s32.totalorder (!%p110_p10), %s475_s27, %s319_s4 }
  0x15   : > { %p321_p13 = pnand (!%p110_p10), %p320_p12, %p451_p4 }
  0x16   : > { %s134_s20 = scalar_select %p133_p11, %s389_s9, 1  ;;  %v150_v11 = vld [vmem:[#allocation2] sm:$0x1] }
  0x17   : > { %p322_p0 = pneg %p321_p13  ;;  %s323_s9 = sshll.u32 %s400_s5, 4  ;;  %s324_s9 = int_to_ptr.vmem [resolvable:$false] %s323_s9 }
  0x18   : > { %s262_s21 = sshll.u32 %s134_s20, 4  ;;  %s325_s12 = scalar_lea.vmem %s324_s9, 32 }
  0x19   : > { %s140_s24 = scalar_lea.vmem %s526_s0, %s262_s21  ;;  %p326_p1 = scmp.lt.s32.totalorder %s475_s27, %s324_s9 }
  0x1a   : > { %v148_v1 = vld [vmem:[%s140_s24] sm:$0xff]  ;;  %v149_v2 = vld [vmem:[%s140_s24 + $0x8] sm:$0xff]  ;;  %p327_p2 = scmp.lt.s32.totalorder %s325_s12, %s319_s4 }
  0x1b   : > { %v152_v3 = vsel %vm151_vm1, %v148_v1, 0.0  ;;  %v153_v4 = vsel %vm151_vm1, %v149_v2, 0.0 }
  0x1c   : > { %v154_v5 = vadd.f32 %v153_v4, %v152_v3  ;;  %p328_p3 = por %p327_p2, %p326_p1 }
  0x1e   : > { %v155_v6 = vrot.slane %v154_v5, 4  ;;  %p329_p5 = pnand %p328_p3, %p322_p0 }
  0x20   : > { %v156_v7 = vadd.f32 %v155_v6, %v154_v5 }
  0x22   : > { %v157_v8 = vrot.slane %v156_v7, 2 }
  0x24   : > { %v158_v9 = vadd.f32 %v157_v8, %v156_v7 }
  0x26   : > { %v159_v10 = vrot.slane %v158_v9, 1 }
  0x28   : > { %v160_v12 = vadd.f32 %v159_v10, %v158_v9 }
  0x2a   : > { %v161_v13 = vadd.f32 %v160_v12, %v150_v11 }
  0x2c   : > { %163 = vst.msk [vmem:[#allocation2] sm:$0x1] %vm146_vm0, %v161_v13 }
  0x33   : > { %v167_v14 = vld [vmem:[#allocation2] sm:$0x1] }
  0x34   : > { %v168_v15 = vmul.f32 0.0625, %v167_v14 }
  0x36   : > { %169 = vst.msk [vmem:[%s131_s26] sm:$0x1] %vm146_vm0, %v168_v15 }
  0x37   : > { %332 = shalt.err (!%p329_p5)
}
  0x38   : > { %s333_s13 = scalar_lea.hbm %s480_s2, 16  ;;  %s337_s20 = scalar_lea.hbm %s527_s1, 32 }
  0x39   : > { %p334_p6 = scmp.ne.s32.totalorder %s480_s2, %s333_s13  ;;  %p338_p10 = scmp.lt.u32.totalorder %s480_s2, %s527_s1 }
  0x3a   : > { %p339_p11 = scmp.lt.u32.totalorder %s337_s20, %s333_s13  ;;  %p341_p13 = scmp.lt.u32.totalorder %s333_s13, %s480_s2 }
  0x3b   : > { %p335_p7 = pnand %p334_p6, %p451_p4 }
  0x3c   : > { %p340_p12 = por %p339_p11, %p338_p10 }
  0x3d   : > { %p336_p9 = pneg %p335_p7 }
  0x3e   : > { %p342_p0 = por %p341_p13, %p340_p12 }
  0x40   : > { %p343_p1 = pnand %p342_p0, %p336_p9 }
  0x42   : > { %346 = shalt.err (!%p343_p1)
}
  0x43   : > { %263 = dma.vmem_to_hbm [thread:$0]  (%p451_p4), %s475_s27, 16, %s480_s2, %s171_s3  }
  0x44 PF: > { %p269_p2 = scmp.ge.s32.totalorder %s397_s11, 2  ;;  %s195_s23 = sand.u32 1, %s377_s6  }
  0x45   : > { %s196_s24 = scalar_lea.sflag [#allocation4], %s195_s23 }
  0x46   : > { %p266_p3 = pnand %p269_p2, %p458_p8 }
  0x48   : > { %372 = dma.done.wait (!%p266_p3), %s196_s24, 16  }
  0x49   : > { %374 = vsyncadd (!%p266_p3), %s196_s24, 4294967280  ;;  %s14_s11 = sadd.s32 1, %s397_s11   ;;  %s530_s6 = smov %s381_s7 }
  0x4a   : > { %p11_p5 = scmp.ge.s32.totalorder %s14_s11, 4   ;;  %s531_s7 = smov %s385_s8 }
  0x4b   : > { %s532_s8 = smov %s464_s19  ;;  %s533_s9 = smov %s393_s10 }
  0x4c   : > { %s534_s10 = smov %s536_s14  ;;  %13 = sbr.rel (!%p11_p5) target bundleno = 4 (0x4), region = 67 }
  0x53   :  { %200 = vsyncpa [#allocation4], 1 }
  0x54   :  { %202 = vsyncpa [#allocation4 + $0x1], 1 }

</bundles_post_ra>
